<compile_context>
chip_gen: v5e
topology: v5e:2x2
jax: 0.10.0
libtpu: 0.0.40
codegen_flags: <defaults>
</compile_context>

<pallas_src>
import math

import jax
import jax.numpy as jnp
from jax.experimental import pallas as pl
from jax.experimental.pallas import tpu as pltpu


def _attn_kernel(q_ref, k_ref, madd_ref, o_ref):
    # q_ref   : (1, 1, TQ, d_k)  bf16   (already scaled by 1/sqrt(d_k))
    # k_ref   : (1, 1, L,  d_k)  bf16   (resident across q-tiles)
    # madd_ref: (1, 1, L)        f32    additive mask, 0 or -1e9
    # o_ref   : (1, 1, TQ, L)
    q = q_ref[0, 0]                                   # (TQ, d_k)
    k = k_ref[0, 0]                                   # (L,  d_k)

    scores = jnp.dot(q, k.T, preferred_element_type=jnp.float32)  # (TQ, L) f32
    scores = scores + madd_ref[0]                     # (1, L) broadcasts over rows

    smax = jnp.max(scores, axis=-1, keepdims=True)
    e = jnp.exp(scores - smax)
    denom = jnp.sum(e, axis=-1, keepdims=True)
    p = e * pl.reciprocal(denom, approx=True)

    o_ref[0, 0] = p.astype(o_ref.dtype)


def _choose_tq(L):
    """Query-tile size: full L for short sequences, else a lane-friendly tile
    keeping the double-buffered (TQ, L) f32 output block under ~8 MiB."""
    if L <= 512:
        return L
    budget = 8 * 1024 * 1024
    for cand in (512, 256, 128, 64, 32, 16):
        if L % cand == 0 and 2 * cand * L * 4 <= budget:
            return cand
    return L  # fallback: no clean divisor, keep one tile


def multi_head_attention(query, key, mask, wq, bq, wk, bk, h,
                         *, out_dtype=jnp.float32):
    """query/key: (B, L, d_model); mask: (B, 1, >=L); weights: nn.Linear style
    (W: (d_model, d_model), b: (d_model,)).  Returns attn probs (B, h, L, L)."""
    B, L, d_model = query.shape
    assert d_model % h == 0
    d_k = d_model // h
    inv_sqrt_dk = 1.0 / math.sqrt(d_k)

    # --- full-width projections (dense MXU matmul in XLA), head split -------
    qh = (query @ wq.T + bq).reshape(B, L, h, d_k).transpose(0, 2, 1, 3)
    kh = (key @ wk.T + bk).reshape(B, L, h, d_k).transpose(0, 2, 1, 3)

    # Fold the 1/sqrt(d_k) scale into q; cast matmul operands to bf16.
    qh = (qh * inv_sqrt_dk).astype(jnp.bfloat16)      # (B, h, L, d_k)
    kh = kh.astype(jnp.bfloat16)                      # (B, h, L, d_k)

    # Additive mask, computed once (mirrors mask[:, :, :query.size(1)]).
    mask_add = (mask[:, :, :L].astype(jnp.float32) - 1.0) * 1e9  # (B, 1, L)

    tq = _choose_tq(L)
    n_qt = L // tq

    return pl.pallas_call(
        _attn_kernel,
        out_shape=jax.ShapeDtypeStruct((B, h, L, L), out_dtype),
        grid_spec=pltpu.PrefetchScalarGridSpec(
            num_scalar_prefetch=0,
            grid=(B, h, n_qt),
            in_specs=[
                # q tile: advances with the q-tile axis
                pl.BlockSpec((1, 1, tq, d_k), lambda b, hd, qi: (b, hd, qi, 0)),
                # K block: independent of qi -> stays resident across q-tiles
                pl.BlockSpec((1, 1, L, d_k), lambda b, hd, qi: (b, hd, 0, 0)),
                # additive mask: per-batch, independent of head / q-tile
                pl.BlockSpec((1, 1, L), lambda b, hd, qi: (b, 0, 0)),
            ],
            out_specs=pl.BlockSpec((1, 1, tq, L),
                                   lambda b, hd, qi: (b, hd, qi, 0)),
        ),
        compiler_params=pltpu.CompilerParams(
            dimension_semantics=("parallel", "parallel", "arbitrary")),
    )(qh, kh, mask_add)


def _reference(query, key, mask, wq, bq, wk, bk, h):
    """Pure-JAX f32 reference mirroring the PyTorch forward (eval mode)."""
    B, L, d_model = query.shape
    d_k = d_model // h
    q = (query @ wq.T + bq).reshape(B, L, h, d_k).transpose(0, 2, 1, 3)
    k = (key @ wk.T + bk).reshape(B, L, h, d_k).transpose(0, 2, 1, 3)
    scores = jnp.einsum("bhqd,bhkd->bhqk", q, k) / math.sqrt(d_k)
    m = mask[:, :, :L][:, None, :, :]                 # (B, 1, 1, L)
    scores = jnp.where(m == 0, -1000000000.0, scores)
    return jax.nn.softmax(scores, axis=-1)


if __name__ == "__main__":
    B, L, d_model, h = 2, 8, 32, 4
    d_k = d_model // h

    key0 = jax.random.PRNGKey(0)
    k_q, k_k, k_wq, k_bq, k_wk, k_bk = jax.random.split(key0, 6)

    query = jax.random.normal(k_q, (B, L, d_model), dtype=jnp.float32)
    key_in = jax.random.normal(k_k, (B, L, d_model), dtype=jnp.float32)

    # Deterministic nn.Linear-style init: U(-1/sqrt(d_model), 1/sqrt(d_model))
    bound = 1.0 / math.sqrt(d_model)
    wq = jax.random.uniform(k_wq, (d_model, d_model), jnp.float32, -bound, bound)
    bq = jax.random.uniform(k_bq, (d_model,), jnp.float32, -bound, bound)
    wk = jax.random.uniform(k_wk, (d_model, d_model), jnp.float32, -bound, bound)
    bk = jax.random.uniform(k_bk, (d_model,), jnp.float32, -bound, bound)

    # Padding-style mask (B, 1, L): batch 1 has the last 2 key positions masked.
    mask = jnp.ones((B, 1, L), dtype=jnp.float32)
    mask = mask.at[1, 0, -2:].set(0.0)

    attn = multi_head_attention(query, key_in, mask, wq, bq, wk, bk, h)
    attn = jax.block_until_ready(attn)

    ref = _reference(query, key_in, mask, wq, bq, wk, bk, h)
    assert attn.shape == (B, h, L, L)
    # bf16 MXU operands + approx reciprocal -> loosened tolerance vs f32 ref.
    assert jnp.allclose(attn, ref, atol=2e-2, rtol=2e-2), "mismatch vs reference"
    # Masked key columns must get (near-)zero probability.
    assert float(jnp.max(attn[1, :, :, -2:])) < 1e-6

    print("KERNEL_OK")
</pallas_src>

<mosaic_0001>
module attributes {stable_mosaic.version = 11 : i64} {
  func.func @_attn_kernel(%arg0: i32, %arg1: i32, %arg2: i32, %arg3: memref<1x1x8x8xbf16, #tpu.memory_space<vmem>>, %arg4: memref<1x1x8x8xbf16, #tpu.memory_space<vmem>>, %arg5: memref<1x1x8xf32, #tpu.memory_space<vmem>>, %arg6: memref<1x1x8x8xf32, #tpu.memory_space<vmem>>) attributes {dimension_semantics = [#tpu.dimension_semantics<parallel>, #tpu.dimension_semantics<parallel>, #tpu.dimension_semantics<arbitrary>], iteration_bounds = array<i64: 2, 4, 1>, scalar_prefetch = 0 : i64, scratch_operands = 0 : i64, tpu.core_type = #tpu.core_type<tc>, window_params = [{transform_indices = @transform_0, window_bounds = array<i64: 1, 1, 8, 8>}, {transform_indices = @transform_1, window_bounds = array<i64: 1, 1, 8, 8>}, {transform_indices = @transform_2, window_bounds = array<i64: 1, 1, 8>}, {transform_indices = @transform_3, window_bounds = array<i64: 1, 1, 8, 8>}]} {
    %c0 = arith.constant 0 : index
    %c0_0 = arith.constant 0 : index
    %c0_1 = arith.constant 0 : index
    %c0_2 = arith.constant 0 : index
    %0 = vector.load %arg3[%c0, %c0_0, %c0_1, %c0_2] : memref<1x1x8x8xbf16, #tpu.memory_space<vmem>>, vector<1x1x8x8xbf16>
    %1 = vector.shape_cast %0 : vector<1x1x8x8xbf16> to vector<8x8xbf16>
    %c0_3 = arith.constant 0 : index
    %c0_4 = arith.constant 0 : index
    %c0_5 = arith.constant 0 : index
    %c0_6 = arith.constant 0 : index
    %2 = vector.load %arg4[%c0_3, %c0_4, %c0_5, %c0_6] : memref<1x1x8x8xbf16, #tpu.memory_space<vmem>>, vector<1x1x8x8xbf16>
    %3 = vector.shape_cast %2 : vector<1x1x8x8xbf16> to vector<8x8xbf16>
    %4 = tpu.transpose %3, [1, 0] : vector<8x8xbf16> -> vector<8x8xbf16>
    %cst = arith.constant dense<0.000000e+00> : vector<8x8xf32>
    %5 = tpu.matmul %1, %4, %cst {dimension_numbers = #tpu.dot_dimension_numbers<[1], [0], [0], [1], [0, 0, 1, 1], [], []>} : vector<8x8xbf16>, vector<8x8xbf16>, vector<8x8xf32> -> vector<8x8xf32>
    %c0_7 = arith.constant 0 : index
    %c0_8 = arith.constant 0 : index
    %c0_9 = arith.constant 0 : index
    %6 = vector.load %arg5[%c0_7, %c0_8, %c0_9] : memref<1x1x8xf32, #tpu.memory_space<vmem>>, vector<1x1x8xf32>
    %7 = vector.shape_cast %6 : vector<1x1x8xf32> to vector<1x8xf32>
    %8 = vector.broadcast %7 : vector<1x8xf32> to vector<8x8xf32>
    %9 = arith.addf %5, %8 : vector<8x8xf32>
    %cst_10 = arith.constant dense<0xFF800000> : vector<8xf32>
    %10 = vector.multi_reduction <maximumf>, %9, %cst_10 [1] : vector<8x8xf32> to vector<8xf32>
    %11 = vector.shape_cast %10 : vector<8xf32> to vector<8x1xf32>
    %12 = vector.broadcast %11 : vector<8x1xf32> to vector<8x8xf32>
    %13 = arith.subf %9, %12 : vector<8x8xf32>
    %14 = math.exp %13 : vector<8x8xf32>
    %cst_11 = arith.constant dense<0.000000e+00> : vector<8xf32>
    %15 = vector.multi_reduction <add>, %14, %cst_11 [1] : vector<8x8xf32> to vector<8xf32>
    %16 = vector.shape_cast %15 : vector<8xf32> to vector<8x1xf32>
    %17 = tpu.reciprocal %16 {approx = true} : vector<8x1xf32> -> vector<8x1xf32>
    %18 = vector.broadcast %17 : vector<8x1xf32> to vector<8x8xf32>
    %19 = arith.mulf %14, %18 : vector<8x8xf32>
    %c0_12 = arith.constant 0 : index
    %c0_13 = arith.constant 0 : index
    %c0_14 = arith.constant 0 : index
    %c0_15 = arith.constant 0 : index
    %20 = vector.load %arg6[%c0_12, %c0_13, %c0_14, %c0_15] : memref<1x1x8x8xf32, #tpu.memory_space<vmem>>, vector<1x1x8x8xf32>
    %21 = vector.shape_cast %20 : vector<1x1x8x8xf32> to vector<8x8xf32>
    %22 = vector.shape_cast %19 : vector<8x8xf32> to vector<1x1x8x8xf32>
    tpu.vector_store %arg6[%c0_12, %c0_13, %c0_14, %c0_15], %22 {strides = array<i32>} : memref<1x1x8x8xf32, #tpu.memory_space<vmem>>, vector<1x1x8x8xf32>,
    return
  }
  func.func @transform_0(%arg0: i32, %arg1: i32, %arg2: i32) -> (i32, i32, i32, i32) {
    %c0_i32 = arith.constant 0 : i32
    %c0_i32_0 = arith.constant 0 : i32
    return %arg0, %arg1, %arg2, %c0_i32 : i32, i32, i32, i32
  }
  func.func @transform_1(%arg0: i32, %arg1: i32, %arg2: i32) -> (i32, i32, i32, i32) {
    %c0_i32 = arith.constant 0 : i32
    %c0_i32_0 = arith.constant 0 : i32
    %c0_i32_1 = arith.constant 0 : i32
    return %arg0, %arg1, %c0_i32, %c0_i32_0 : i32, i32, i32, i32
  }
  func.func @transform_2(%arg0: i32, %arg1: i32, %arg2: i32) -> (i32, i32, i32) {
    %c0_i32 = arith.constant 0 : i32
    %c0_i32_0 = arith.constant 0 : i32
    %c0_i32_1 = arith.constant 0 : i32
    return %arg0, %c0_i32, %c0_i32_0 : i32, i32, i32
  }
  func.func @transform_3(%arg0: i32, %arg1: i32, %arg2: i32) -> (i32, i32, i32, i32) {
    %c0_i32 = arith.constant 0 : i32
    %c0_i32_0 = arith.constant 0 : i32
    return %arg0, %arg1, %arg2, %c0_i32 : i32, i32, i32, i32
  }
}

</mosaic_0001>

<bundles_post_ra>
// kernel: tpu_custom_call.1
= control target key start
LH: loop header
LB: loop body
LE: loop exit
PB: predicated region body
PF: predicated region fallthrough
CT: control target
= control target key end

     0   :  { %s1100_s0 = inlined_call_operand.hbm [shape: bf16[2,4,8,8], index: 0, kind: input, shape index: {}]   ;;  %s1101_s1 = inlined_call_operand.hbm [shape: bf16[2,4,8,8], index: 1, kind: input, shape index: {}]   ;;  %s1102_s2 = inlined_call_operand.hbm [shape: f32[2,1,8], index: 2, kind: input, shape index: {}]   ;;  %s1103_s3 = inlined_call_operand.hbm [shape: f32[2,4,8,8], index: 3, kind: output, shape index: {}]  }
   0x1   :  { %1111 = sst [smem:[#allocation20_spill]] %s1101_s1 }
   0x2   :  { %1112 = sst [smem:[#allocation21_spill]] %s1103_s3 }
   0x3   :  { %8 = vsyncpa [#allocation3], 0 }
   0x4   :  { %10 = vsyncpa [#allocation3 + $0x1], 0 }
   0x5   :  { %11 = vsyncpa [#allocation6], 0 }
   0x6   :  { %13 = vsyncpa [#allocation6 + $0x1], 0 }
   0x7   :  { %14 = vsyncpa [#allocation4], 0 }
   0x8   :  { %16 = vsyncpa [#allocation4 + $0x1], 0  ;;  %s861_s12 = smov 0   ;;  %s863_s13 = smov 0  }
   0x9   :  { %s865_s14 = smov 0   ;;  %s867_s15 = smov 0  }
   0xa   :  { %s869_s16 = smov 0   ;;  %s871_s17 = smov 0  }
   0xb   :  { %s873_s18 = smov 0   ;;  %s875_s19 = smov 0  }
   0xc   :  { %s877_s20 = smov 0   ;;  %s879_s21 = smov 0  }
   0xd   :  { %s881_s22 = smov 0  }
   0xe LB: > { %1113 = sst [smem:[#allocation13_spill]] %s811_s15  ;;  %s917_s23 = sadd.s32 4294967295, %s839_s22   ;;  %s839_s22 = sphi %s881_s22, %s22_s22   ;;  %s835_s21 = sphi %s879_s21, %s1142_s21   ;;  %s831_s20 = sphi %s877_s20, %s1134_s20   ;;  %s827_s19 = sphi %s875_s19, %s1141_s19   ;;  %s823_s18 = sphi %s873_s18, %s1133_s18   ;;  %s819_s17 = sphi %s871_s17, %s1132_s17   ;;  %s815_s16 = sphi %s869_s16, %s1140_s16   ;;  %s811_s15 = sphi %s867_s15, %s1139_s15   ;;  %s807_s14 = sphi %s865_s14, %s1138_s14   ;;  %s803_s13 = sphi %s863_s13, %s1137_s13   ;;  %s799_s12 = sphi %s861_s12, %s1136_s12  }
   0xf   : > { %1114 = sst [smem:[#allocation14_spill]] %s819_s17  ;;  %s483_s24 = sadd.s32 4294967294, %s839_s22  }
  0x10   : > { %1115 = sst [smem:[#allocation15_spill]] %s831_s20  ;;  %s37_s25 = sadd.s32 1, %s831_s20 }
  0x11   : > { %s41_s26 = sadd.s32 1, %s835_s21  ;;  %p39_p0 = scmp.ge.s32.totalorder %s37_s25, 4 }
  0x12   : > { %s52_s27 = sadd.s32 1, %s819_s17  ;;  %p59_p1 = scmp.ne.s32.totalorder %s819_s17, %s815_s16 }
  0x13   : > { %p60_p2 = scmp.eq.s32.totalorder %s839_s22, 0  ;;  %s1144_s25 = smov (%p39_p0, %s37_s25), 0 }
  0x14   : > { %1116 = sst [smem:[#allocation16_spill]] %s1144_s25  ;;  %s1146_s26 = smov (!%p39_p0, %s41_s26), %s835_s21 }
  0x15   : > { %s46_s28 = ssub.s32 %s831_s20, %s1144_s25  ;;  %p933_p3 = por %p60_p2, %p59_p1 }
  0x16   : > { %p43_p4 = scmp.ge.s32.totalorder %s1146_s26, 2  ;;  %p65_p5 = scmp.ne.s32.totalorder %s815_s16, %s811_s15 }
  0x17   : > { %p66_p6 = scmp.eq.s32.totalorder %s917_s23, 0  ;;  %p147_p7 = scmp.eq.s32.totalorder %s917_s23, 7 }
  0x18   : > { %s1148_s26 = smov (%p43_p4, %s1146_s26), 0  ;;  %p153_p10 = scmp.eq.s32.totalorder %s483_s24, 7 }
  0x19   : > { %1118 = sst [smem:[#allocation17_spill]] %s1148_s26  ;;  %p945_p8 = por %p66_p6, %p65_p5 }
  0x1a   : > { %p949_p9 = por %p147_p7, %p59_p1  ;;  %s955_s5 = ssub.s32 %s835_s21, %s1148_s26 }
  0x1b   : > { %s47_s6 = sor.u32 %s46_s28, %s955_s5  ;;  %p104_p11 = scmp.eq.s32.totalorder %s955_s5, 0 }
  0x1c   : > { %p50_p12 = scmp.eq.s32.totalorder %s47_s6, 0  ;;  %p959_p13 = por %p153_p10, %p65_p5 }
  0x1d   : > { %p524_p0 = scmp.lt.s32.totalorder %s839_s22, 8  ;;  %s173_s9 = sand.u32 1, %s819_s17  }
  0x1e   : > { %s1121_s7 = scalar_select %p959_p13, 1, 0 }
  0x1f   : > { %s965_s8 = scalar_select %p50_p12, %s819_s17, %s52_s27  }
  0x20   : > { %1122 = sst [smem:[#allocation18_spill]] %s1121_s7  ;;  %s487_s10 = sshll.u32 %s835_s21, 2 }
  0x21   : > { %1123 = sst [smem:[#allocation19_spill]] %s965_s8  ;;  %s486_s11 = sshll.u32 %s173_s9, 2 }
  0x22   : > { %s182_s26 = sadd.s32 %s831_s20, %s487_s10  ;;  %p974_p1 = pnand %p524_p0, %p933_p3 }
  0x23   : > { %s488_s25 = sshll.u32 %s182_s26, 2  ;;  %s195_s28 = sand.u32 1, %s839_s22  }
  0x24   : > { %s1125_s1 = sld [smem:[#allocation20_spill]]  ;;  %s199_s27 = scalar_lea.vmem [#allocation5], %s486_s11 }
  0x25   : > { %s209_s8 = sshll.u32 %s199_s27, 4  ;;  %p492_p3 = scmp.ge.s32.totalorder %s839_s22, 1  ;;  %s210_s8 = int_to_ptr.vmem [resolvable:$true] %s209_s8 }
  0x26   : > { %s196_s26 = scalar_lea.sflag [#allocation6], %s195_s28  ;;  %p231_p4 = scmp.lt.s32.totalorder %s839_s22, 9 }
  0x27   : > { %s184_s10 = scalar_lea.hbm %s1100_s0, %s488_s25  ;;  %s177_s6 = scalar_lea.vmem [#allocation2], %s486_s11 }
  0x28   : > { %p986_p5 = pnand %p492_p3, %p231_p4  ;;  %s188_s27 = sshll.u32 %s177_s6, 4  ;;  %s189_s27 = int_to_ptr.vmem [resolvable:$true] %s188_s27 }
  0x29   : > { %s174_s28 = scalar_lea.sflag [#allocation3], %s173_s9  ;;  %p113_p7 = scmp.ne.s32.totalorder %s807_s14, %s803_s13 }
  0x2a   : > { %s205_s15 = scalar_lea.hbm %s1125_s1, %s488_s25  ;;  %s186_s1 = sshll.u32 %s184_s10, 4  ;;  %s187_s1 = int_to_ptr.hbm [resolvable:$true] %s186_s1 }
  0x2b   : > { %s207_s17 = sshll.u32 %s205_s15, 4  ;;  %p119_p10 = scmp.ne.s32.totalorder %s803_s13, %s799_s12  ;;  %s208_s17 = int_to_ptr.hbm [resolvable:$true] %s207_s17 }
  0x2c   : > { %516 = dma.hbm_to_vmem [thread:$0]  (!%p974_p1), %s208_s17, 64, %s210_s8, %s196_s26  }
  0x2d   : > { %513 = dma.hbm_to_vmem [thread:$0]  (!%p974_p1), %s187_s1, 64, %s189_s27, %s174_s28  }
  0x2e   : > { %s106_s17 = sadd.s32 1, %s807_s14  ;;  %s218_s20 = sand.u32 1, %s807_s14  }
  0x2f   : > { %s999_s8 = scalar_select %p104_p11, %s807_s14, %s106_s17  }
  0x30   : > { %s222_s25 = scalar_lea.hbm %s1102_s2, %s835_s21  ;;  %p115_p12 = por %p113_p7, %p60_p2 }
  0x31   : > { %p1014_p3 = por %p119_p10, %p66_p6  ;;  %s224_s9 = sshll.u32 %s222_s25, 4  ;;  %s225_s9 = int_to_ptr.hbm [resolvable:$true] %s224_s9 }
  0x32   : > { %s219_s1 = scalar_lea.vmem [#allocation7], %s218_s20  ;;  %p517_p11 = pnand %p524_p0, %p115_p12 }
  0x33   : > { %s226_s5 = sshll.u32 %s219_s1, 4  ;;  %235 = sbr.rel (%p986_p5) target bundleno = 457 (0x1c9), region = 32  ;;  %s227_s5 = int_to_ptr.vmem [resolvable:$true] %s226_s5 }
  0x34   : > { %519 = dma.hbm_to_vmem [thread:$0]  (!%p517_p11), %s225_s9, 16, %s227_s5, %s196_s26  }
  0x35   : > { %s1023_s3 = sand.u32 (!%p986_p5), 1, %s815_s16  }
  0x36   : > { %s493_s12 = sshll.u32 (!%p986_p5), %s1023_s3, 2  ;;  %s238_s24 = scalar_lea.sflag (!%p986_p5), [#allocation3], %s1023_s3 }
  0x37   : > { %s241_s7 = scalar_lea.vmem (!%p986_p5), [#allocation2], %s493_s12 }
  0x38   : > { %782 = dma.done.wait (%p945_p8), %s238_s24, 64  }
  0x39   : > { %784 = vsyncadd (%p945_p8), %s238_s24, 4294967232  ;;  %s247_s20 = sand.u32 1, %s917_s23   ;;  %s251_s29 = scalar_lea.vmem [#allocation5], %s493_s12 }
  0x3a   : > { %s248_s26 = scalar_lea.sflag [#allocation6], %s247_s20 }
  0x3b   : > { %786 = dma.done.wait (%p945_p8), %s248_s26, 64  }
  0x3c   : > { %788 = vsyncadd (%p945_p8), %s248_s26, 4294967232  ;;  %s259_s10 = sand.u32 1, %s803_s13  }
  0x3d   : > { %s260_s6 = scalar_lea.vmem [#allocation7], %s259_s10 }
  0x3e   : > { %790 = dma.done.wait (%p1014_p3), %s248_s26, 16  }
  0x3f   : > { %792 = vsyncadd (%p1014_p3), %s248_s26, 4294967280  ;;  %vm300_vm0 = vcmask 64512   ;;  %v295_v0 = vld [vmem:[%s251_s29] sm:$0xf]  ;;  %v294_v2 = vld [vmem:[%s241_s7] sm:$0xf] }
  0x40   : > { %v305_v1 = vsel %vm300_vm0, %v295_v0, 0  ;;  %v614_v3 = vld [vmem:[%s260_s6] ss:$0 sm:$0xff]  ;;  %s498_s23 = sshll.u32 %s827_s19, 2  ;;  %s495_s27 = sshll.u32 %s1023_s3, 3 }
  0x41   : > { %314 = vmatpush.bf16.xpose.msra.mxu0 %v305_v1  ;;  %s344_s30 = sadd.s32 %s823_s18, %s498_s23  ;;  %s1128_s25 = sld [smem:[#allocation21_spill]] }
  0x42   : > { %s499_s28 = sshll.u32 %s344_s30, 3  ;;  %s292_s9 = scalar_lea.vmem [#allocation8], %s495_s27 }
  0x43   : > { %s348_s1 = sshll.u32 %s292_s9, 4  ;;  %s333_s19 = scalar_lea.sflag [#allocation4], %s1023_s3  ;;  %s349_s1 = int_to_ptr.vmem [resolvable:$true] %s348_s1 }
  0x47   : > { %s346_s11 = scalar_lea.hbm %s1128_s25, %s499_s28  ;;  %s729_s20 = scalar_lea.hbm %s1128_s25, 64 }
  0x48   : > { %496 = vmatmul.msk.bf16.vlgmr.msra.gmra.mxu0 %vm300_vm0, %v294_v2  ;;  %s350_s5 = sshll.u32 %s346_s11, 4  ;;  %s351_s5 = int_to_ptr.hbm [resolvable:$true] %s350_s5 }
  0x49   : > { %s723_s18 = sshra.s32 %s351_s5, 4  ;;  %s724_s18 = int_to_ptr.hbm [resolvable:$true] %s723_s18 }
  0x4a   : > { %s725_s12 = scalar_lea.hbm %s724_s18, 8  ;;  %p730_p0 = scmp.lt.s32.totalorder %s724_s18, %s1128_s25 }
  0x4b   : > { %p726_p2 = scmp.ne.s32.totalorder %s724_s18, %s725_s12  ;;  %p731_p1 = scmp.lt.s32.totalorder %s729_s20, %s725_s12 }
  0x4d   : > { %p727_p6 = pnand %p726_p2, %p949_p9  ;;  %p732_p4 = por %p731_p1, %p730_p0 }
  0x4f   : > { %p728_p8 = pneg %p727_p6 }
  0x51   : > { %p733_p5 = pnand %p732_p4, %p728_p8 }
  0xc5   : > { %v316_v4 = vpop.f32.mrf.mxu0 }
  0xc6   : > { %v317_v5 = vadd.f32 %v614_v3, %v316_v4 }
  0xc8   : > { %v320_v6 = vsel %vm300_vm0, %v317_v5, -inf }
  0xc9   : > { %321 = vmax.xlane.f32.xlu0 %v320_v6 }
  0xcd   : > { %v318_v7 = vpop.f32.mrf.mxu0 }
 0x13c   : > { %v322_v8 = vpop.xlane.xlu0 %321 }
 0x13d   : > { %v323_v9 = vsub.f32 %v317_v5, %v322_v8 }
 0x13f   : > { %v324_v10 = vmul.f32 1.442695, %v323_v9 }
 0x141   : > { %615 = vpow2.f32 %v324_v10 }
 0x147   : > { %v616_v11 = vpop.eup %615 }
 0x148   : > { %v326_v12 = vsel %vm300_vm0, %v616_v11, 0.0 }
 0x149   : > { %327 = vadd.xlane.f32.xlu0 %v326_v12 }
 0x1bc   : > { %v328_v13 = vpop.xlane.xlu0 %327 }
 0x1bd   : > { %617 = vrcp.f32 %v328_v13 }
 0x1c3   : > { %v618_v14 = vpop.eup %617 }
 0x1c4   : > { %v330_v15 = vmul.f32 %v618_v14, %v616_v11 }
 0x1c6   : > { %331 = vst.msk [vmem:[%s292_s9] sm:$0xff] %vm300_vm0, %v330_v15 }
 0x1c7   : > { %736 = shalt.err (!%p733_p5)
}
 0x1c8   : > { %508 = dma.vmem_to_hbm [thread:$0]  (%p949_p9), %s349_s1, 128, %s351_s5, %s333_s19  }
 0x1c9 PF: > { %s1129_s3 = sld [smem:[#allocation13_spill]]  ;;  %p525_p7 = scmp.ge.s32.totalorder %s839_s22, 2 }
 0x1cb   : > { %p521_p10 = pnand %p525_p7, %p959_p13 }
 0x1cd   : > { %p522_p12 = pneg %p521_p10 }
 0x1cf   : > { %s362_s6 = sand.u32 1, %s1129_s3  }
 0x1d0   : > { %s363_s23 = scalar_lea.sflag [#allocation4], %s362_s6 }
 0x1d1   : > { %794 = dma.done.wait (%p522_p12), %s363_s23, 128  }
 0x1d2   : > { %796 = vsyncadd (%p522_p12), %s363_s23, 4294967168  ;;  %s22_s22 = sadd.s32 1, %s839_s22   ;;  %s1131_s4 = sld [smem:[#allocation14_spill]] }
 0x1d3   : > { %p19_p3 = scmp.ge.s32.totalorder %s22_s22, 10   ;;  %s1132_s17 = sld [smem:[#allocation19_spill]] }
 0x1d4   : > { %s1133_s18 = sld [smem:[#allocation15_spill]]  ;;  %s1136_s12 = smov %s803_s13 }
 0x1d5   : > { %s1134_s20 = sld [smem:[#allocation16_spill]]  ;;  %s1137_s13 = smov %s807_s14 }
 0x1d6   : > { %s1135_s30 = sld [smem:[#allocation17_spill]]  ;;  %s1138_s14 = smov %s999_s8 }
 0x1d7   : > { %s1139_s15 = smov %s815_s16  ;;  %s1141_s19 = smov %s835_s21 }
 0x1d8   : > { %s1140_s16 = smov %s1131_s4  ;;  %21 = sbr.rel (!%p19_p3) target bundleno = 14 (0xe), region = 101 }
 0x1dc   : > { %s1142_s21 = smov %s1135_s30 }
 0x1dd   :  { %369 = vsyncpa [#allocation3], 1 }
 0x1de   :  { %371 = vsyncpa [#allocation3 + $0x1], 1 }
 0x1df   :  { %372 = vsyncpa [#allocation6], 1 }
 0x1e0   :  { %374 = vsyncpa [#allocation6 + $0x1], 1 }
 0x1e1   :  { %375 = vsyncpa [#allocation4], 1 }
 0x1e2   :  { %377 = vsyncpa [#allocation4 + $0x1], 1 }

</bundles_post_ra>
